<compile_context>
chip_gen: v6e
topology: v6e:2x2x1
jax: 0.10.0
libtpu: 0.0.40
codegen_flags: <defaults>
</compile_context>

<pallas_src>
import jax
import jax.numpy as jnp
from jax.experimental import pallas as pl
from jax.experimental.pallas import tpu as pltpu


def _make_theta(n_embeddings: int, n_tokens: int) -> jnp.ndarray:
    """Deterministic parameter init, identical formula to the PyTorch __init__.

    Note: the PyTorch module uses exponent 2*ii/n_embeddings with ii = the raw
    column index (not 2*floor(ii/2)), so we reproduce that exactly.
    """
    ii = jnp.arange(n_embeddings, dtype=jnp.float32)           # embedding dim index
    pos = jnp.arange(n_tokens, dtype=jnp.float32)              # token position
    angles = pos[:, None] / jnp.power(10000.0, 2.0 * ii[None, :] / n_embeddings)
    even = (jnp.arange(n_embeddings) % 2) == 0
    theta = jnp.where(even[None, :], jnp.sin(angles), jnp.cos(angles))
    return theta.astype(jnp.float32)                           # (n_tokens, n_embeddings)


def _copy_block_kernel(table_ref, out_ref):
    # Pure tiled memcpy: one contiguous (TM, n_emb) slab of the table per grid step.
    out_ref[...] = table_ref[...]


def _round_up(x: int, m: int) -> int:
    return ((x + m - 1) // m) * m


def positional_embedding_forward(xx: jnp.ndarray,
                                 theta: jnp.ndarray) -> jnp.ndarray:
    """Pallas implementation of PositionalEmbedding.forward.

    xx:    any array; only xx.shape[-1] (= seq_len) is used, as in PyTorch.
    theta: (n_tokens, n_embeddings) frozen embedding table.
    returns (seq_len, n_embeddings) float32 == theta[:seq_len, :].
    """
    seq_len = xx.shape[-1]
    n_tokens, n_emb = theta.shape
    assert seq_len <= n_tokens, "sequence longer than positional table"

    # Row-tile size: multiple of 8 (f32 sublane), large for DMA efficiency, capped so
    # double-buffered in + out tiles (~4 * TM * n_emb * 4 B) fit comfortably in VMEM
    # on every generation (v7x has only 64 MiB physical VMEM).
    bytes_per_row = n_emb * 4
    vmem_budget = 32 * 1024 * 1024  # total for double-buffered input + output tiles
    max_tm_by_vmem = max(8, ((vmem_budget // (4 * bytes_per_row)) // 8) * 8)
    tm = min(512, _round_up(seq_len, 8), max_tm_by_vmem)

    grid = (pl.cdiv(seq_len, tm),)

    out = pl.pallas_call(
        _copy_block_kernel,
        out_shape=jax.ShapeDtypeStruct((seq_len, n_emb), jnp.float32),
        grid=grid,
        in_specs=[pl.BlockSpec((tm, n_emb), lambda i: (i, 0))],
        out_specs=pl.BlockSpec((tm, n_emb), lambda i: (i, 0)),
        compiler_params=pltpu.CompilerParams(
            dimension_semantics=("parallel",),      # independent blocks -> 2 TCs on v7x
            vmem_limit_bytes=64 * 1024 * 1024,
        ),
    )(theta)
    return out


if __name__ == "__main__":
    # Small, module-consistent shapes.
    n_embeddings = 32
    n_tokens = 16
    batch, seq_len = 2, 8

    key = jax.random.PRNGKey(0)
    # xx plays the role of the token-id input; only its last dim is used.
    xx = jax.random.randint(key, (batch, seq_len), minval=0, maxval=n_tokens,
                            dtype=jnp.int32)

    theta = _make_theta(n_embeddings, n_tokens)

    out = positional_embedding_forward(xx, theta)
    out = jax.block_until_ready(out)

    # Reference check: embedding(arange(L)) == first L rows of the table.
    ref = theta[:seq_len, :]
    assert out.shape == (seq_len, n_embeddings)
    assert out.dtype == jnp.float32
    assert jnp.allclose(out, ref, atol=1e-6), "mismatch vs reference"

    print("KERNEL_OK")
</pallas_src>

<mosaic_0001>
module attributes {stable_mosaic.version = 11 : i64} {
  func.func @_copy_block_kernel(%arg0: i32, %arg1: memref<8x32xf32, #tpu.memory_space<vmem>>, %arg2: memref<8x32xf32, #tpu.memory_space<vmem>>) attributes {dimension_semantics = [#tpu.dimension_semantics<parallel>], iteration_bounds = array<i64: 1>, scalar_prefetch = 0 : i64, scratch_operands = 0 : i64, tpu.core_type = #tpu.core_type<tc>, window_params = [{transform_indices = @transform_0, window_bounds = array<i64: 8, 32>}, {transform_indices = @transform_1, window_bounds = array<i64: 8, 32>}]} {
    %c0 = arith.constant 0 : index
    %c0_0 = arith.constant 0 : index
    %0 = vector.load %arg1[%c0, %c0_0] : memref<8x32xf32, #tpu.memory_space<vmem>>, vector<8x32xf32>
    %c0_1 = arith.constant 0 : index
    %c0_2 = arith.constant 0 : index
    %1 = vector.load %arg2[%c0_1, %c0_2] : memref<8x32xf32, #tpu.memory_space<vmem>>, vector<8x32xf32>
    tpu.vector_store %arg2[%c0_1, %c0_2], %0 {strides = array<i32>} : memref<8x32xf32, #tpu.memory_space<vmem>>, vector<8x32xf32>,
    return
  }
  func.func @transform_0(%arg0: i32) -> (i32, i32) {
    %c0_i32 = arith.constant 0 : i32
    %c0_i32_0 = arith.constant 0 : i32
    return %arg0, %c0_i32 : i32, i32
  }
  func.func @transform_1(%arg0: i32) -> (i32, i32) {
    %c0_i32 = arith.constant 0 : i32
    %c0_i32_0 = arith.constant 0 : i32
    return %arg0, %c0_i32 : i32, i32
  }
}

</mosaic_0001>

<bundles_post_ra>
// kernel: tpu_custom_call.1
= control target key start
LH: loop header
LB: loop body
LE: loop exit
PB: predicated region body
PF: predicated region fallthrough
CT: control target
= control target key end

     0   :  { %6 = vsyncpa [#allocation3], 0  ;;  %s103_s0 = inlined_call_operand.hbm [shape: f32[16,32], index: 0, kind: input, shape index: {}]   ;;  %s104_s1 = inlined_call_operand.hbm [shape: f32[8,32], index: 1, kind: output, shape index: {}]  }
   0x1   :  { %7 = vsyncpa [#allocation4], 0  ;;  %s85_s6 = smov [#allocation2]  }
   0x2   :  { %s14_s7 = sshll.u32 %s85_s6, 4  ;;  %s15_s7 = int_to_ptr.vmem [resolvable:$true] %s14_s7 }
   0x3   :  { %s49_s8 = scalar_lea.vmem %s15_s7, 128  ;;  %p54_p1 = scmp.lt.s32.totalorder %s15_s7, %s15_s7 }
   0x4   :  { %p50_p0 = scmp.ne.s32.totalorder %s15_s7, %s49_s8  ;;  %p55_p2 = scmp.lt.s32.totalorder %s49_s8, %s49_s8 }
   0x6   :  { %p56_p3 = por %p55_p2, %p54_p1 }
   0x8   :  { %p57_p4 = pnand %p56_p3, %p50_p0 }
   0xa   :  { %60 = shalt.err (!%p57_p4)
}
   0xb   :  { %17 = dma.hbm_to_vmem [thread:$0]  %s103_s0, 128, %s15_s7, [#allocation3]  }
   0xc   :  { %81 = dma.done.wait [#allocation3], 128  }
   0xd   :  { %82 = vsyncadd [#allocation3], 4294967168  ;;  %s86_s11 = smov [#allocation5]   ;;  %vm22_vm0 = vcmask 261120   ;;  %v21_v0 = vld [vmem:[#allocation2] sm:$0xff] }
   0xe   :  { %s30_s12 = sshll.u32 %s86_s11, 4  ;;  %23 = vst.msk [vmem:[#allocation5] sm:$0xff] %vm22_vm0, %v21_v0  ;;  %s31_s12 = int_to_ptr.vmem [resolvable:$true] %s30_s12 }
   0xf   :  { %s61_s13 = scalar_lea.vmem %s31_s12, 128  ;;  %p66_p6 = scmp.lt.s32.totalorder %s31_s12, %s31_s12 }
  0x10   :  { %p62_p5 = scmp.ne.s32.totalorder %s31_s12, %s61_s13  ;;  %p67_p7 = scmp.lt.s32.totalorder %s61_s13, %s61_s13 }
  0x12   :  { %p68_p8 = por %p67_p7, %p66_p6 }
  0x14   :  { %p69_p9 = pnand %p68_p8, %p62_p5 }
  0x16   :  { %72 = shalt.err (!%p69_p9)
}
  0x17   :  { %33 = dma.vmem_to_hbm [thread:$0]  %s31_s12, 128, %s104_s1, [#allocation4]  }
  0x18   :  { %83 = dma.done.wait [#allocation4], 128  }
  0x19   :  { %84 = vsyncadd [#allocation4], 4294967168 }
  0x1a   :  { %37 = vsyncpa [#allocation3], 1 }
  0x1b   :  { %38 = vsyncpa [#allocation4], 1 }

</bundles_post_ra>
